<compile_context>
chip_gen: v5e
topology: v5e:2x2
jax: 0.10.0
libtpu: 0.0.40
codegen_flags: <defaults>
</compile_context>

<pallas_src>
import jax
import jax.numpy as jnp
import numpy as np
from jax import lax
from jax.experimental import pallas as pl
from jax.experimental.pallas import tpu as pltpu


# ----------------------------------------------------------------------------
# Fused kernel: conv_0(3x3+BN+ReLU) -> conv_1(3x3+BN) + id_conv(1x1+BN) + add + ReLU
# One grid step == one block of B images. All convs are lane-dense banded
# matmuls on (B*H, W*C) slabs.
# ----------------------------------------------------------------------------
def _xresblock_kernel(x_ref, m0_ref, b0_ref, m1_ref, mid_ref, bsum_ref,
                      o_ref, xpad_ref, y0pad_ref):
    bb, h, wcin = x_ref.shape          # (B, H, W*Cin)
    wcmid = m0_ref.shape[-1]           # W*Cmid
    wcout = m1_ref.shape[-1]           # W*Cout

    def mm(a3, w2):
        # (B, H, K) x (K, N) -> (B*H, N), bf16 operands, f32 accumulation.
        b_, h_, k_ = a3.shape
        return jnp.dot(a3.reshape(b_ * h_, k_), w2,
                       preferred_element_type=jnp.float32)

    x = x_ref[...]                                     # bf16 (B, H, W*Cin)

    # --- conv_0: three banded matmuls over row(sublane)-shifted views --------
    # Row-padded bf16 scratch. Only the 2 halo rows are zeroed (cheap); the
    # interior is fully overwritten every step. Re-zeroed each step so the
    # kernel is correct under dimension_semantics=("parallel",) where grid
    # steps (and hence per-core scratch) are split across TensorCores.
    xpad_ref[:, 0:1, :] = jnp.zeros((bb, 1, wcin), xpad_ref.dtype)
    xpad_ref[:, h + 1:h + 2, :] = jnp.zeros((bb, 1, wcin), xpad_ref.dtype)
    xpad_ref[:, pl.ds(1, h), :] = x

    acc0 = mm(x, m0_ref[1])                            # centre kernel row
    acc0 += mm(xpad_ref[:, 0:h, :], m0_ref[0])         # kernel row above
    acc0 += mm(xpad_ref[:, 2:h + 2, :], m0_ref[2])     # kernel row below
    y0 = jnp.maximum(acc0 + b0_ref[...], 0.0)          # f32 BN bias + ReLU
    y0_bf = y0.astype(jnp.bfloat16).reshape(bb, h, wcmid)

    # --- conv_1 (3x3+BN) + id_conv (1x1+BN, block-diag) + residual + ReLU ----
    # conv_0 output stays resident in VMEM (bf16 row-padded scratch).
    y0pad_ref[:, 0:1, :] = jnp.zeros((bb, 1, wcmid), y0pad_ref.dtype)
    y0pad_ref[:, h + 1:h + 2, :] = jnp.zeros((bb, 1, wcmid), y0pad_ref.dtype)
    y0pad_ref[:, pl.ds(1, h), :] = y0_bf

    acc = mm(x, mid_ref[...])                          # id_conv (1x1, banded)
    acc += mm(y0_bf, m1_ref[1])                        # conv_1 centre row
    acc += mm(y0pad_ref[:, 0:h, :], m1_ref[0])         # conv_1 row above
    acc += mm(y0pad_ref[:, 2:h + 2, :], m1_ref[2])     # conv_1 row below

    out = jnp.maximum(acc + bsum_ref[...], 0.0)        # combined b1+bid, ReLU
    o_ref[...] = out.reshape(bb, h, wcout).astype(o_ref.dtype)


# ----------------------------------------------------------------------------
# Wrapper: NHWC/bf16 native (no NCHW transpose passes over HBM) + pallas_call.
# ----------------------------------------------------------------------------
def xresblock_forward(x_nhwc, prepared, *, batch_block=None):
    """XResBlock forward. Input NHWC bf16, output NHWC bf16."""
    n, h, w, cin = x_nhwc.shape
    wcin = w * cin
    wcmid = prepared["m0"].shape[-1]
    wcout = prepared["m1"].shape[-1]
    cout = wcout // w
    assert prepared["m0"].shape[1] == wcin
    assert wcout % 128 == 0            # lane-dense output slab

    if batch_block is None:
        # Batch-block the grid, but keep >= 2 grid steps when possible so
        # v7x's second TensorCore gets a balanced block (no-op on v5e/v6e).
        batch_block = min(max(1, n // 2), 64) if n >= 2 else 1
        while n % batch_block:
            batch_block -= 1
    bb = batch_block
    grid = (n // bb,)

    # Layout-only reshape: (N, H, W, C) -> (N, H, W*C) lane-dense slab.
    x_slab = x_nhwc.reshape(n, h, wcin)

    out_slab = pl.pallas_call(
        _xresblock_kernel,
        out_shape=jax.ShapeDtypeStruct((n, h, wcout), jnp.bfloat16),
        grid_spec=pltpu.PrefetchScalarGridSpec(
            num_scalar_prefetch=0,
            grid=grid,
            in_specs=[
                pl.BlockSpec((bb, h, wcin), lambda i: (i, 0, 0)),     # x slab
                pl.BlockSpec((3, wcin, wcmid), lambda i: (0, 0, 0)),  # banded w0
                pl.BlockSpec((1, wcmid), lambda i: (0, 0)),           # b0 (lanes)
                pl.BlockSpec((3, wcmid, wcout), lambda i: (0, 0, 0)), # banded w1
                pl.BlockSpec((wcin, wcout), lambda i: (0, 0)),        # id_conv
                pl.BlockSpec((1, wcout), lambda i: (0, 0)),           # b1+bid
            ],
            out_specs=pl.BlockSpec((bb, h, wcout), lambda i: (i, 0, 0)),
            scratch_shapes=[
                pltpu.VMEM((bb, h + 2, wcin), jnp.bfloat16),   # row-padded x
                pltpu.VMEM((bb, h + 2, wcmid), jnp.bfloat16),  # row-padded y0
            ],
        ),
        compiler_params=pltpu.CompilerParams(
            dimension_semantics=("parallel",)),
    )(x_slab, prepared["m0"], prepared["b0"], prepared["m1"],
      prepared["mid"], prepared["bsum"])

    return out_slab.reshape(n, h, w, cout)


def xresblock_forward_nchw(x_nchw, prepared):
    """Convenience adapter for PyTorch NCHW callers (not on the hot path)."""
    x = jnp.transpose(x_nchw, (0, 2, 3, 1)).astype(jnp.bfloat16)
    out = xresblock_forward(x, prepared)
    return jnp.transpose(out, (0, 3, 1, 2))


# ----------------------------------------------------------------------------
# Deterministic parameters + one-time banded-weight packing + pure-JAX reference.
# ----------------------------------------------------------------------------
def _folded_bn(key, c):
    k1, k2, k3, k4 = jax.random.split(key, 4)
    gamma = 1.0 + 0.1 * jax.random.normal(k1, (c,))
    beta = 0.1 * jax.random.normal(k2, (c,))
    mean = 0.1 * jax.random.normal(k3, (c,))
    var = jax.nn.softplus(jax.random.normal(k4, (c,))) + 0.5
    eps = 1e-5
    scale = gamma / jnp.sqrt(var + eps)
    bias = beta - mean * scale
    return (scale.reshape(1, c).astype(jnp.float32),
            bias.reshape(1, c).astype(jnp.float32))


def make_params(key, cin, cmid, cout):
    """Raw parameters: HWIO conv weights + folded inference-mode BN (scale, bias)."""
    ks = jax.random.split(key, 6)
    w0 = 0.2 * jax.random.normal(ks[0], (3, 3, cin, cmid), jnp.float32)
    w1 = 0.2 * jax.random.normal(ks[1], (3, 3, cmid, cout), jnp.float32)
    wid = 0.2 * jax.random.normal(ks[2], (cin, cout), jnp.float32)
    s0, b0 = _folded_bn(ks[3], cmid)
    s1, b1 = _folded_bn(ks[4], cout)
    sid, bid = _folded_bn(ks[5], cout)
    return dict(w0=w0, s0=s0, b0=b0, w1=w1, s1=s1, b1=b1,
                wid=wid, sid=sid, bid=bid)


def _band_matrices(k_hwio, scale, w_img):
    """3x3 conv kernel -> 3 banded (W*Cin, W*Cout) matrices (one per kernel row)
    with BN scale folded in.  y[h, wo*Cout+co] += sum x[h+dh-1, wi*Cin+ci] * M[dh]."""
    k = np.asarray(k_hwio, np.float32) * np.asarray(scale, np.float32).reshape(1, 1, 1, -1)
    _, _, cin, cout = k.shape
    m = np.zeros((3, w_img * cin, w_img * cout), np.float32)
    for dh in range(3):
        for dw in range(3):
            for wo in range(w_img):
                wi = wo + dw - 1
                if 0 <= wi < w_img:
                    m[dh, wi * cin:(wi + 1) * cin, wo * cout:(wo + 1) * cout] = k[dh, dw]
    return m


def _block_diag(wid, scale, w_img):
    """1x1 conv -> block-diagonal (W*Cin, W*Cout) matrix with BN scale folded in."""
    w = np.asarray(wid, np.float32) * np.asarray(scale, np.float32).reshape(1, -1)
    cin, cout = w.shape
    m = np.zeros((w_img * cin, w_img * cout), np.float32)
    for i in range(w_img):
        m[i * cin:(i + 1) * cin, i * cout:(i + 1) * cout] = w
    return m


def prepare_params(raw, w_img):
    """One-time prep: fold BN scales into weights, build banded/lane-tiled
    matrices, cast matmul operands to bf16, combine the post-residual biases."""
    cmid = raw["s0"].shape[-1]
    cout = raw["s1"].shape[-1]
    m0 = _band_matrices(raw["w0"], np.asarray(raw["s0"]).reshape(-1), w_img)
    m1 = _band_matrices(raw["w1"], np.asarray(raw["s1"]).reshape(-1), w_img)
    mid = _block_diag(raw["wid"], np.asarray(raw["sid"]).reshape(-1), w_img)
    b0 = np.tile(np.asarray(raw["b0"]).reshape(-1), w_img).reshape(1, w_img * cmid)
    bsum = np.tile(np.asarray(raw["b1"] + raw["bid"]).reshape(-1),
                   w_img).reshape(1, w_img * cout)
    return dict(m0=jnp.asarray(m0, jnp.bfloat16),
                b0=jnp.asarray(b0, jnp.float32),
                m1=jnp.asarray(m1, jnp.bfloat16),
                mid=jnp.asarray(mid, jnp.bfloat16),
                bsum=jnp.asarray(bsum, jnp.float32))


def reference_forward(x_nhwc, raw):
    """Pure-JAX (lax.conv) NHWC reference using the same bf16 quantization points
    as the kernel: bf16 conv operands, f32 accumulation, f32 bias/ReLU/add."""
    cin = raw["wid"].shape[0]
    cmid = raw["s0"].shape[-1]
    cout = raw["s1"].shape[-1]
    dn = ("NHWC", "HWIO", "NHWC")

    def conv(inp, wgt):
        return lax.conv_general_dilated(inp, wgt, (1, 1), "SAME",
                                        dimension_numbers=dn,
                                        preferred_element_type=jnp.float32)

    x = x_nhwc.astype(jnp.bfloat16)
    w0q = (raw["w0"] * raw["s0"].reshape(1, 1, 1, cmid)).astype(jnp.bfloat16)
    w1q = (raw["w1"] * raw["s1"].reshape(1, 1, 1, cout)).astype(jnp.bfloat16)
    widq = (raw["wid"] * raw["sid"].reshape(1, cout)).astype(jnp.bfloat16)

    y0 = jax.nn.relu(conv(x, w0q) + raw["b0"].reshape(1, 1, 1, cmid))
    y1 = conv(y0.astype(jnp.bfloat16), w1q) + raw["b1"].reshape(1, 1, 1, cout)
    ident = conv(x, widq.reshape(1, 1, cin, cout)) + raw["bid"].reshape(1, 1, 1, cout)
    return jax.nn.relu(y1 + ident)     # NHWC, f32


# ----------------------------------------------------------------------------
if __name__ == "__main__":
    N, CIN, H, W = 2, 4, 16, 16
    CMID = 8
    COUT = CMID * 1          # expansion = 1

    key = jax.random.PRNGKey(0)
    kx, kp = jax.random.split(key)
    # Producer-side layout/dtype: NHWC, bf16 (matmul operand dtype) so the
    # wrapper does no NCHW<->NHWC HBM transpose passes.
    x = jax.random.normal(kx, (N, H, W, CIN), jnp.float32).astype(jnp.bfloat16)
    raw = make_params(kp, CIN, CMID, COUT)
    prepared = prepare_params(raw, W)

    fwd = jax.jit(xresblock_forward)
    out = jax.block_until_ready(fwd(x, prepared))
    ref = jax.block_until_ready(reference_forward(x, raw))

    assert out.shape == (N, H, W, COUT), out.shape
    # bf16 matmul operands + bf16 output store (f32 accumulation/bias/ReLU):
    # compare against the bf16-operand f32 reference with bf16-level tolerance.
    np.testing.assert_allclose(np.asarray(out, np.float32), np.asarray(ref),
                               rtol=3e-2, atol=3e-2)
    print("KERNEL_OK")
</pallas_src>

<mosaic_0001>
module attributes {stable_mosaic.version = 11 : i64} {
  func.func @_xresblock_kernel(%arg0: i32, %arg1: memref<1x16x64xbf16, #tpu.memory_space<vmem>>, %arg2: memref<3x64x128xbf16, #tpu.memory_space<vmem>>, %arg3: memref<1x128xf32, #tpu.memory_space<vmem>>, %arg4: memref<3x128x128xbf16, #tpu.memory_space<vmem>>, %arg5: memref<64x128xbf16, #tpu.memory_space<vmem>>, %arg6: memref<1x128xf32, #tpu.memory_space<vmem>>, %arg7: memref<1x16x128xbf16, #tpu.memory_space<vmem>>, %arg8: memref<1x18x64xbf16, #tpu.memory_space<vmem>>, %arg9: memref<1x18x128xbf16, #tpu.memory_space<vmem>>) attributes {dimension_semantics = [#tpu.dimension_semantics<parallel>], iteration_bounds = array<i64: 2>, scalar_prefetch = 0 : i64, scratch_operands = 2 : i64, tpu.core_type = #tpu.core_type<tc>, window_params = [{transform_indices = @transform_0, window_bounds = array<i64: 1, 16, 64>}, {pipeline_mode = #tpu.pipeline_mode<synchronous>, transform_indices = @transform_1, window_bounds = array<i64: 3, 64, 128>}, {pipeline_mode = #tpu.pipeline_mode<synchronous>, transform_indices = @transform_2, window_bounds = array<i64: 1, 128>}, {pipeline_mode = #tpu.pipeline_mode<synchronous>, transform_indices = @transform_3, window_bounds = array<i64: 3, 128, 128>}, {pipeline_mode = #tpu.pipeline_mode<synchronous>, transform_indices = @transform_4, window_bounds = array<i64: 64, 128>}, {pipeline_mode = #tpu.pipeline_mode<synchronous>, transform_indices = @transform_5, window_bounds = array<i64: 1, 128>}, {transform_indices = @transform_6, window_bounds = array<i64: 1, 16, 128>}]} {
    %c0 = arith.constant 0 : index
    %c0_0 = arith.constant 0 : index
    %c0_1 = arith.constant 0 : index
    %0 = vector.load %arg1[%c0, %c0_0, %c0_1] : memref<1x16x64xbf16, #tpu.memory_space<vmem>>, vector<1x16x64xbf16>
    %cst = arith.constant 0.000000e+00 : bf16
    %1 = vector.broadcast %cst : bf16 to vector<1x1x64xbf16>
    %c0_2 = arith.constant 0 : index
    %c0_3 = arith.constant 0 : index
    %c0_4 = arith.constant 0 : index
    %2 = vector.load %arg8[%c0_2, %c0_3, %c0_4] : memref<1x18x64xbf16, #tpu.memory_space<vmem>>, vector<1x1x64xbf16>
    tpu.vector_store %arg8[%c0_2, %c0_3, %c0_4], %1 {strides = array<i32>} : memref<1x18x64xbf16, #tpu.memory_space<vmem>>, vector<1x1x64xbf16>,
    %cst_5 = arith.constant 0.000000e+00 : bf16
    %3 = vector.broadcast %cst_5 : bf16 to vector<1x1x64xbf16>
    %c0_6 = arith.constant 0 : index
    %c17 = arith.constant 17 : index
    %c0_7 = arith.constant 0 : index
    %4 = vector.load %arg8[%c0_6, %c17, %c0_7] : memref<1x18x64xbf16, #tpu.memory_space<vmem>>, vector<1x1x64xbf16>
    tpu.vector_store %arg8[%c0_6, %c17, %c0_7], %3 {strides = array<i32>} : memref<1x18x64xbf16, #tpu.memory_space<vmem>>, vector<1x1x64xbf16>,
    %c0_8 = arith.constant 0 : index
    %c1 = arith.constant 1 : index
    %c0_9 = arith.constant 0 : index
    %5 = vector.load %arg8[%c0_8, %c1, %c0_9] : memref<1x18x64xbf16, #tpu.memory_space<vmem>>, vector<1x16x64xbf16>
    tpu.vector_store %arg8[%c0_8, %c1, %c0_9], %0 {strides = array<i32>} : memref<1x18x64xbf16, #tpu.memory_space<vmem>>, vector<1x16x64xbf16>,
    %c1_10 = arith.constant 1 : index
    %c0_11 = arith.constant 0 : index
    %c0_12 = arith.constant 0 : index
    %6 = vector.load %arg2[%c1_10, %c0_11, %c0_12] : memref<3x64x128xbf16, #tpu.memory_space<vmem>>, vector<1x64x128xbf16>
    %7 = vector.shape_cast %6 : vector<1x64x128xbf16> to vector<64x128xbf16>
    %8 = vector.shape_cast %0 : vector<1x16x64xbf16> to vector<16x64xbf16>
    %cst_13 = arith.constant dense<0.000000e+00> : vector<16x128xf32>
    %9 = tpu.matmul %8, %7, %cst_13 {dimension_numbers = #tpu.dot_dimension_numbers<[1], [0], [0], [1], [0, 0, 1, 1], [], []>} : vector<16x64xbf16>, vector<64x128xbf16>, vector<16x128xf32> -> vector<16x128xf32>
    %c0_14 = arith.constant 0 : index
    %c0_15 = arith.constant 0 : index
    %c0_16 = arith.constant 0 : index
    %10 = vector.load %arg8[%c0_14, %c0_15, %c0_16] : memref<1x18x64xbf16, #tpu.memory_space<vmem>>, vector<1x16x64xbf16>
    %c0_17 = arith.constant 0 : index
    %c0_18 = arith.constant 0 : index
    %c0_19 = arith.constant 0 : index
    %11 = vector.load %arg2[%c0_17, %c0_18, %c0_19] : memref<3x64x128xbf16, #tpu.memory_space<vmem>>, vector<1x64x128xbf16>
    %12 = vector.shape_cast %11 : vector<1x64x128xbf16> to vector<64x128xbf16>
    %13 = vector.shape_cast %10 : vector<1x16x64xbf16> to vector<16x64xbf16>
    %cst_20 = arith.constant dense<0.000000e+00> : vector<16x128xf32>
    %14 = tpu.matmul %13, %12, %cst_20 {dimension_numbers = #tpu.dot_dimension_numbers<[1], [0], [0], [1], [0, 0, 1, 1], [], []>} : vector<16x64xbf16>, vector<64x128xbf16>, vector<16x128xf32> -> vector<16x128xf32>
    %15 = arith.addf %9, %14 : vector<16x128xf32>
    %c0_21 = arith.constant 0 : index
    %c2 = arith.constant 2 : index
    %c0_22 = arith.constant 0 : index
    %16 = vector.load %arg8[%c0_21, %c2, %c0_22] : memref<1x18x64xbf16, #tpu.memory_space<vmem>>, vector<1x16x64xbf16>
    %c2_23 = arith.constant 2 : index
    %c0_24 = arith.constant 0 : index
    %c0_25 = arith.constant 0 : index
    %17 = vector.load %arg2[%c2_23, %c0_24, %c0_25] : memref<3x64x128xbf16, #tpu.memory_space<vmem>>, vector<1x64x128xbf16>
    %18 = vector.shape_cast %17 : vector<1x64x128xbf16> to vector<64x128xbf16>
    %19 = vector.shape_cast %16 : vector<1x16x64xbf16> to vector<16x64xbf16>
    %cst_26 = arith.constant dense<0.000000e+00> : vector<16x128xf32>
    %20 = tpu.matmul %19, %18, %cst_26 {dimension_numbers = #tpu.dot_dimension_numbers<[1], [0], [0], [1], [0, 0, 1, 1], [], []>} : vector<16x64xbf16>, vector<64x128xbf16>, vector<16x128xf32> -> vector<16x128xf32>
    %21 = arith.addf %15, %20 : vector<16x128xf32>
    %c0_27 = arith.constant 0 : index
    %c0_28 = arith.constant 0 : index
    %22 = vector.load %arg3[%c0_27, %c0_28] : memref<1x128xf32, #tpu.memory_space<vmem>>, vector<1x128xf32>
    %23 = vector.broadcast %22 : vector<1x128xf32> to vector<16x128xf32>
    %24 = arith.addf %21, %23 : vector<16x128xf32>
    %cst_29 = arith.constant 0.000000e+00 : f32
    %25 = vector.broadcast %cst_29 : f32 to vector<16x128xf32>
    %26 = arith.maximumf %24, %25 : vector<16x128xf32>
    %27 = arith.truncf %26 : vector<16x128xf32> to vector<16x128xbf16>
    %28 = vector.shape_cast %27 : vector<16x128xbf16> to vector<1x16x128xbf16>
    %cst_30 = arith.constant 0.000000e+00 : bf16
    %29 = vector.broadcast %cst_30 : bf16 to vector<1x1x128xbf16>
    %c0_31 = arith.constant 0 : index
    %c0_32 = arith.constant 0 : index
    %c0_33 = arith.constant 0 : index
    %30 = vector.load %arg9[%c0_31, %c0_32, %c0_33] : memref<1x18x128xbf16, #tpu.memory_space<vmem>>, vector<1x1x128xbf16>
    tpu.vector_store %arg9[%c0_31, %c0_32, %c0_33], %29 {strides = array<i32>} : memref<1x18x128xbf16, #tpu.memory_space<vmem>>, vector<1x1x128xbf16>,
    %cst_34 = arith.constant 0.000000e+00 : bf16
    %31 = vector.broadcast %cst_34 : bf16 to vector<1x1x128xbf16>
    %c0_35 = arith.constant 0 : index
    %c17_36 = arith.constant 17 : index
    %c0_37 = arith.constant 0 : index
    %32 = vector.load %arg9[%c0_35, %c17_36, %c0_37] : memref<1x18x128xbf16, #tpu.memory_space<vmem>>, vector<1x1x128xbf16>
    tpu.vector_store %arg9[%c0_35, %c17_36, %c0_37], %31 {strides = array<i32>} : memref<1x18x128xbf16, #tpu.memory_space<vmem>>, vector<1x1x128xbf16>,
    %c0_38 = arith.constant 0 : index
    %c1_39 = arith.constant 1 : index
    %c0_40 = arith.constant 0 : index
    %33 = vector.load %arg9[%c0_38, %c1_39, %c0_40] : memref<1x18x128xbf16, #tpu.memory_space<vmem>>, vector<1x16x128xbf16>
    tpu.vector_store %arg9[%c0_38, %c1_39, %c0_40], %28 {strides = array<i32>} : memref<1x18x128xbf16, #tpu.memory_space<vmem>>, vector<1x16x128xbf16>,
    %c0_41 = arith.constant 0 : index
    %c0_42 = arith.constant 0 : index
    %34 = vector.load %arg5[%c0_41, %c0_42] : memref<64x128xbf16, #tpu.memory_space<vmem>>, vector<64x128xbf16>
    %35 = vector.shape_cast %0 : vector<1x16x64xbf16> to vector<16x64xbf16>
    %cst_43 = arith.constant dense<0.000000e+00> : vector<16x128xf32>
    %36 = tpu.matmul %35, %34, %cst_43 {dimension_numbers = #tpu.dot_dimension_numbers<[1], [0], [0], [1], [0, 0, 1, 1], [], []>} : vector<16x64xbf16>, vector<64x128xbf16>, vector<16x128xf32> -> vector<16x128xf32>
    %c1_44 = arith.constant 1 : index
    %c0_45 = arith.constant 0 : index
    %c0_46 = arith.constant 0 : index
    %37 = vector.load %arg4[%c1_44, %c0_45, %c0_46] : memref<3x128x128xbf16, #tpu.memory_space<vmem>>, vector<1x128x128xbf16>
    %38 = vector.shape_cast %37 : vector<1x128x128xbf16> to vector<128x128xbf16>
    %39 = vector.shape_cast %28 : vector<1x16x128xbf16> to vector<16x128xbf16>
    %cst_47 = arith.constant dense<0.000000e+00> : vector<16x128xf32>
    %40 = tpu.matmul %39, %38, %cst_47 {dimension_numbers = #tpu.dot_dimension_numbers<[1], [0], [0], [1], [0, 0, 1, 1], [], []>} : vector<16x128xbf16>, vector<128x128xbf16>, vector<16x128xf32> -> vector<16x128xf32>
    %41 = arith.addf %36, %40 : vector<16x128xf32>
    %c0_48 = arith.constant 0 : index
    %c0_49 = arith.constant 0 : index
    %c0_50 = arith.constant 0 : index
    %42 = vector.load %arg9[%c0_48, %c0_49, %c0_50] : memref<1x18x128xbf16, #tpu.memory_space<vmem>>, vector<1x16x128xbf16>
    %c0_51 = arith.constant 0 : index
    %c0_52 = arith.constant 0 : index
    %c0_53 = arith.constant 0 : index
    %43 = vector.load %arg4[%c0_51, %c0_52, %c0_53] : memref<3x128x128xbf16, #tpu.memory_space<vmem>>, vector<1x128x128xbf16>
    %44 = vector.shape_cast %43 : vector<1x128x128xbf16> to vector<128x128xbf16>
    %45 = vector.shape_cast %42 : vector<1x16x128xbf16> to vector<16x128xbf16>
    %cst_54 = arith.constant dense<0.000000e+00> : vector<16x128xf32>
    %46 = tpu.matmul %45, %44, %cst_54 {dimension_numbers = #tpu.dot_dimension_numbers<[1], [0], [0], [1], [0, 0, 1, 1], [], []>} : vector<16x128xbf16>, vector<128x128xbf16>, vector<16x128xf32> -> vector<16x128xf32>
    %47 = arith.addf %41, %46 : vector<16x128xf32>
    %c0_55 = arith.constant 0 : index
    %c2_56 = arith.constant 2 : index
    %c0_57 = arith.constant 0 : index
    %48 = vector.load %arg9[%c0_55, %c2_56, %c0_57] : memref<1x18x128xbf16, #tpu.memory_space<vmem>>, vector<1x16x128xbf16>
    %c2_58 = arith.constant 2 : index
    %c0_59 = arith.constant 0 : index
    %c0_60 = arith.constant 0 : index
    %49 = vector.load %arg4[%c2_58, %c0_59, %c0_60] : memref<3x128x128xbf16, #tpu.memory_space<vmem>>, vector<1x128x128xbf16>
    %50 = vector.shape_cast %49 : vector<1x128x128xbf16> to vector<128x128xbf16>
    %51 = vector.shape_cast %48 : vector<1x16x128xbf16> to vector<16x128xbf16>
    %cst_61 = arith.constant dense<0.000000e+00> : vector<16x128xf32>
    %52 = tpu.matmul %51, %50, %cst_61 {dimension_numbers = #tpu.dot_dimension_numbers<[1], [0], [0], [1], [0, 0, 1, 1], [], []>} : vector<16x128xbf16>, vector<128x128xbf16>, vector<16x128xf32> -> vector<16x128xf32>
    %53 = arith.addf %47, %52 : vector<16x128xf32>
    %c0_62 = arith.constant 0 : index
    %c0_63 = arith.constant 0 : index
    %54 = vector.load %arg6[%c0_62, %c0_63] : memref<1x128xf32, #tpu.memory_space<vmem>>, vector<1x128xf32>
    %55 = vector.broadcast %54 : vector<1x128xf32> to vector<16x128xf32>
    %56 = arith.addf %53, %55 : vector<16x128xf32>
    %cst_64 = arith.constant 0.000000e+00 : f32
    %57 = vector.broadcast %cst_64 : f32 to vector<16x128xf32>
    %58 = arith.maximumf %56, %57 : vector<16x128xf32>
    %59 = vector.shape_cast %58 : vector<16x128xf32> to vector<1x16x128xf32>
    %60 = arith.truncf %59 : vector<1x16x128xf32> to vector<1x16x128xbf16>
    %c0_65 = arith.constant 0 : index
    %c0_66 = arith.constant 0 : index
    %c0_67 = arith.constant 0 : index
    %61 = vector.load %arg7[%c0_65, %c0_66, %c0_67] : memref<1x16x128xbf16, #tpu.memory_space<vmem>>, vector<1x16x128xbf16>
    tpu.vector_store %arg7[%c0_65, %c0_66, %c0_67], %60 {strides = array<i32>} : memref<1x16x128xbf16, #tpu.memory_space<vmem>>, vector<1x16x128xbf16>,
    return
  }
  func.func @transform_0(%arg0: i32) -> (i32, i32, i32) {
    %c0_i32 = arith.constant 0 : i32
    %c0_i32_0 = arith.constant 0 : i32
    %c0_i32_1 = arith.constant 0 : i32
    return %arg0, %c0_i32, %c0_i32_0 : i32, i32, i32
  }
  func.func @transform_1(%arg0: i32) -> (i32, i32, i32) {
    %c0_i32 = arith.constant 0 : i32
    %c0_i32_0 = arith.constant 0 : i32
    %c0_i32_1 = arith.constant 0 : i32
    %c0_i32_2 = arith.constant 0 : i32
    return %c0_i32, %c0_i32_0, %c0_i32_1 : i32, i32, i32
  }
  func.func @transform_2(%arg0: i32) -> (i32, i32) {
    %c0_i32 = arith.constant 0 : i32
    %c0_i32_0 = arith.constant 0 : i32
    %c0_i32_1 = arith.constant 0 : i32
    return %c0_i32, %c0_i32_0 : i32, i32
  }
  func.func @transform_3(%arg0: i32) -> (i32, i32, i32) {
    %c0_i32 = arith.constant 0 : i32
    %c0_i32_0 = arith.constant 0 : i32
    %c0_i32_1 = arith.constant 0 : i32
    %c0_i32_2 = arith.constant 0 : i32
    return %c0_i32, %c0_i32_0, %c0_i32_1 : i32, i32, i32
  }
  func.func @transform_4(%arg0: i32) -> (i32, i32) {
    %c0_i32 = arith.constant 0 : i32
    %c0_i32_0 = arith.constant 0 : i32
    %c0_i32_1 = arith.constant 0 : i32
    return %c0_i32, %c0_i32_0 : i32, i32
  }
  func.func @transform_5(%arg0: i32) -> (i32, i32) {
    %c0_i32 = arith.constant 0 : i32
    %c0_i32_0 = arith.constant 0 : i32
    %c0_i32_1 = arith.constant 0 : i32
    return %c0_i32, %c0_i32_0 : i32, i32
  }
  func.func @transform_6(%arg0: i32) -> (i32, i32, i32) {
    %c0_i32 = arith.constant 0 : i32
    %c0_i32_0 = arith.constant 0 : i32
    %c0_i32_1 = arith.constant 0 : i32
    return %arg0, %c0_i32, %c0_i32_0 : i32, i32, i32
  }
}

</mosaic_0001>

<bundles_post_ra>
// kernel: xresblock_forward.1
= control target key start
LH: loop header
LB: loop body
LE: loop exit
PB: predicated region body
PF: predicated region fallthrough
CT: control target
= control target key end

     0   :  { %11 = vsyncpa [#allocation5], 0  ;;  %s1570_s0 = inlined_call_operand.vmem [shape: bf16[2,16,64], index: 0, kind: input, shape index: {}]   ;;  %s1571_s1 = inlined_call_operand.hbm [shape: bf16[3,64,128], index: 1, kind: input, shape index: {}]   ;;  %s1572_s2 = inlined_call_operand.vmem [shape: f32[1,128], index: 2, kind: input, shape index: {}]   ;;  %s1573_s3 = inlined_call_operand.vmem [shape: bf16[3,128,128], index: 3, kind: input, shape index: {}]   ;;  %s1574_s4 = inlined_call_operand.hbm [shape: bf16[64,128], index: 4, kind: input, shape index: {}]   ;;  %s1575_s5 = inlined_call_operand.vmem [shape: f32[1,128], index: 5, kind: input, shape index: {}]   ;;  %s1576_s6 = inlined_call_operand.vmem [shape: bf16[2,16,128], index: 6, kind: output, shape index: {}]  }
   0x1   :  { %12 = vsyncpa [#allocation7], 0  ;;  %s1394_s21 = smov 0  }
   0x2 LB: > { %s191_s24 = sshll.u32 %s1571_s1, 4  ;;  %s963_s25 = sadd.s32 4294967295, %s1353_s21   ;;  %s1353_s21 = sphi %s1394_s21, %s18_s21   ;;  %s192_s24 = int_to_ptr.hbm [resolvable:$true] %s191_s24 }
   0x3   : > { %p965_p0 = scmp.ge.s32.totalorder %s1353_s21, 1  ;;  %p180_p1 = scmp.lt.s32.totalorder %s1353_s21, 3 }
   0x4   : > { %p1261_p2 = scmp.eq.s32.totalorder %s963_s25, 0  ;;  %s1355_s27 = smov [#allocation4]  }
   0x5   : > { %p1405_p3 = pnand %p965_p0, %p180_p1  ;;  %s193_s28 = sshll.u32 %s1355_s27, 4  ;;  %s194_s28 = int_to_ptr.vmem [resolvable:$true] %s193_s28 }
   0x6   : > { %s211_s7 = sshll.u32 %s1574_s4, 4  ;;  %s1356_s8 = smov [#allocation6]   ;;  %s212_s7 = int_to_ptr.hbm [resolvable:$true] %s211_s7 }
   0x7   : > { %p1254_p4 = pneg %p1405_p3  ;;  %s213_s9 = sshll.u32 %s1356_s8, 4  ;;  %s214_s9 = int_to_ptr.vmem [resolvable:$true] %s213_s9 }
   0x8   : > { %s1357_s10 = smov 64   ;;  %s1358_s11 = smov 4  }
   0x9   : > { %p1255_p5 = pnand %p1261_p2, %p1254_p4  ;;  %240 = sbr.rel (%p1405_p3) target bundleno = 369 (0x171), region = 44 }
   0xb   : > { %1257 = dma.hbm_to_vmem [thread:$0]  (!%p1255_p5), %s192_s24, 1536, %s194_s28, [#allocation5], %s1357_s10, %s1357_s10, %s1358_s11  }
   0xc   : > { %1260 = dma.hbm_to_vmem [thread:$0]  (!%p1255_p5), %s212_s7, 512, %s214_s9, [#allocation7], %s1357_s10, %s1357_s10, %s1358_s11  }
   0xe   : > { %1344 = dma.done.wait (%p1261_p2), [#allocation5], 1536  }
   0xf   : > { %1346 = vsyncadd (%p1261_p2), [#allocation5], 4294965760 }
  0x10   : > { %1348 = dma.done.wait (%p1261_p2), [#allocation7], 512  }
  0x11   : > { %1350 = vsyncadd (%p1261_p2), [#allocation7], 4294966784  ;;  %p276_p6 = scmp.lt.s32.totalorder %s963_s25, 1  ;;  %vm290_vm0 = vsmask.f32 256  ;;  %v1205_v0 = vld [vmem:[#allocation4 + $0x18] sm:$0xff] }
  0x12   : > { %v1200_v1 = vld [vmem:[#allocation4 + $0x38] sm:$0xff]  ;;  %vm289_vm1 = vcmask 516096   ;;  %vm295_vm2 = vsmask.f32 7938  ;;  %388 = vmatpush.bf16.msra.mxu0 %v1205_v0  ;;  %v1204_v3 = vld [vmem:[#allocation4 + $0x10] sm:$0xff]  ;;  %v1203_v12 = vld [vmem:[#allocation4 + $0x8] sm:$0xff] }
  0x13   : > { %s1587_s25 = smov (!%p276_p6, %s963_s25), 1  ;;  %v1210_v2 = vld [vmem:[#allocation4 + $0x58] sm:$0xff]  ;;  %434 = vmatpush.bf16.msra.mxu1 %v1200_v1  ;;  %v1199_v4 = vld [vmem:[#allocation4 + $0x30] sm:$0xff]  ;;  %vm1432_vm3 = vmand %vm289_vm1, %vm290_vm0  ;;  %vm300_vm4 = vsmask.f32 4368  ;;  %vm322_vm7 = vcmask 519168  }
  0x14   : > { %s1194_s12 = sshll.u32 %s1587_s25, 3  ;;  %499 = vmatpush.bf16.msra.mxu2 %v1210_v2  ;;  %v1209_v6 = vld [vmem:[#allocation4 + $0x50] sm:$0xff]  ;;  %v292_v9 = vld [vmem:[#allocation2] sm:$0x1]  ;;  %vm1439_vm5 = vmand %vm289_vm1, %vm295_vm2  ;;  %vm380_vm9 = vcmask 523264   ;;  %vm464_vm10 = vcmask 1046528  }
  0x15   : > { %s1429_s15 = scalar_lea.vmem %s1570_s0, %s1194_s12  ;;  %v1198_v13 = vld [vmem:[#allocation4 + $0x28] sm:$0xff]  ;;  %v293_v15 = vsel %vm1432_vm3, 0, %v292_v9  ;;  %v297_v20 = vld [vmem:[#allocation2 + $0x8] sm:$0x1]  ;;  %vm1449_vm6 = vmor %vm290_vm0, %vm300_vm4  ;;  %vm521_vm11 = vcmask 1040384   ;;  %vm550_vm14 = vcmask 1043456   ;;  %s285_s30 = scalar_lea.vmem %s1576_s6, %s1194_s12 }
  0x16   : > { %v287_v7 = vld [vmem:[%s1429_s15] sm:$0xf]  ;;  %v288_v8 = vld [vmem:[%s1429_s15 + $0x4] sm:$0xf]  ;;  %389 = vmatpush.bf16.msra.mxu0 %v1204_v3  ;;  %294 = vst [vmem:[#allocation2] sm:$0x1] %v293_v15  ;;  %vm323_vm8 = vmand %vm322_vm7, %vm295_vm2 }
  0x17   : > { %v303_v11 = vshrl.u32 %v287_v7, 16  ;;  %v1208_v14 = vld [vmem:[#allocation4 + $0x48] sm:$0xff]  ;;  %v311_v16 = vshrl.u32 %v288_v8, 16  ;;  %v314_v17 = vshll.u32 %v288_v8, 16  ;;  %435 = vmatpush.bf16.msra.mxu1 %v1199_v4  ;;  %v306_v19 = vshll.u32 %v287_v7, 16  ;;  %v1202_v26 = vld [vmem:[#allocation4] sm:$0xff]  ;;  %vm1489_vm12 = vmand %vm521_vm11, %vm290_vm0 }
  0x18   : > { %500 = vmatpush.bf16.msra.mxu2 %v1209_v6  ;;  %v298_v22 = vsel %vm1439_vm5, 0, %v297_v20  ;;  %v1197_v27 = vld [vmem:[#allocation4 + $0x20] sm:$0xff]  ;;  %v1457_v33 = vld [vmem:[%s1429_s15] sm:$0xff]  ;;  %v1221_v48 = vld [vmem:[%s1573_s3 + $0x70] sm:$0xff] }
  0x19   : > { %v305_v18 = vrot.slane %v303_v11, 7  ;;  %v313_v21 = vrot.slane %v311_v16, 7  ;;  %299 = vst [vmem:[#allocation2 + $0x8] sm:$0x1] %v298_v22  ;;  %v1207_v30 = vld [vmem:[#allocation4 + $0x40] sm:$0xff]  ;;  %v1220_v49 = vld [vmem:[%s1573_s3 + $0x68] sm:$0xff]  ;;  %vm526_vm13 = vmand %vm521_vm11, %vm295_vm2 }
  0x1a   : > { %390 = vmatpush.bf16.msra.mxu0 %v1203_v12  ;;  %v1222_v47 = vld [vmem:[%s1573_s3 + $0x78] sm:$0xff]  ;;  %v1219_v50 = vld [vmem:[%s1573_s3 + $0x60] sm:$0xff]  ;;  %v1230_v53 = vld [vmem:[%s1573_s3 + $0x30] sm:$0xff] }
  0x1b   : > { %v309_v24 = vrot.slane %v305_v18, 4  ;;  %v316_v25 = vor.u32 %v314_v17, %v313_v21  ;;  %436 = vmatpush.bf16.msra.mxu1 %v1198_v13  ;;  %v308_v28 = vor.u32 %v306_v19, %v305_v18  ;;  %v318_v31 = vrot.slane %v313_v21, 4  ;;  %638 = vmatpush.bf16.msra.mxu3 %v1222_v47  ;;  %v1231_v51 = vld [vmem:[%s1573_s3 + $0x38] sm:$0xff]  ;;  %v523_v55 = vld [vmem:[#allocation3] sm:$0x1]  ;;  %v1217_v58 = vld [vmem:[%s1573_s3 + $0x50] sm:$0xff] }
  0x1c   : > { %501 = vmatpush.bf16.msra.mxu2 %v1208_v14  ;;  %v1218_v52 = vld [vmem:[%s1573_s3 + $0x58] sm:$0xff]  ;;  %v524_v56 = vsel %vm1489_vm12, 0, %v523_v55  ;;  %v1229_v59 = vld [vmem:[%s1573_s3 + $0x28] sm:$0xff]  ;;  %v1214_v60 = vld [vmem:[#allocation6 + $0x18] sm:$0xff] }
  0x1d   : > { %v317_v29 = vsel %vm1449_vm6, %v309_v24, %v316_v25  ;;  %v324_v32 = vld [vmem:[#allocation2] sm:$0xf]  ;;  %525 = vst [vmem:[#allocation3] sm:$0x1] %v524_v56  ;;  %v1240_v57 = vld [vmem:[%s1573_s3 + $0xb8] sm:$0xff]  ;;  %v1239_v61 = vld [vmem:[%s1573_s3 + $0xb0] sm:$0xff] }
  0x1e   : > { %328 = vst.msk [vmem:[#allocation2 + $0x4] sm:$0xf] %vm322_vm7, %v317_v29  ;;  %391 = vmatpush.bf16.msra.mxu0 %v1202_v26  ;;  %v325_v34 = vsel %vm323_vm8, %v308_v28, %v324_v32  ;;  %v527_v62 = vld [vmem:[#allocation3 + $0x8] sm:$0x1]  ;;  %v1216_v63 = vld [vmem:[%s1573_s3 + $0x48] sm:$0xff]  ;;  %v1228_v1 = vld [vmem:[%s1573_s3 + $0x20] sm:$0xff] }
  0x1f   : > { %437 = vmatpush.bf16.msra.mxu1 %v1197_v27  ;;  %326 = vst [vmem:[#allocation2] sm:$0xf] %v325_v34  ;;  %639 = vmatpush.bf16.msra.mxu3 %v1221_v48  ;;  %v528_v0 = vsel %vm526_vm13, 0, %v527_v62  ;;  %v1213_v2 = vld [vmem:[#allocation6 + $0x10] sm:$0xff]  ;;  %v1215_v4 = vld [vmem:[%s1573_s3 + $0x40] sm:$0xff]  ;;  %v1227_v5 = vld [vmem:[%s1573_s3 + $0x18] sm:$0xff] }
  0x20   : > { %502 = vmatpush.bf16.msra.mxu2 %v1207_v30  ;;  %v329_v35 = vld [vmem:[#allocation2 + $0x8] sm:$0x1]  ;;  %529 = vst [vmem:[#allocation3 + $0x8] sm:$0x1] %v528_v0  ;;  %v1212_v6 = vld [vmem:[#allocation6 + $0x8] sm:$0xff]  ;;  %v1226_v8 = vld [vmem:[%s1573_s3 + $0x10] sm:$0xff] }
  0x21   : > { %v330_v36 = vsel %vm1432_vm3, %v318_v31, %v329_v35  ;;  %v1238_v3 = vld [vmem:[%s1573_s3 + $0xa8] sm:$0xff]  ;;  %v1237_v7 = vld [vmem:[%s1573_s3 + $0xa0] sm:$0xff]  ;;  %v1211_v9 = vld [vmem:[#allocation6] sm:$0xff] }
  0x22   : > { %1017 = vmatmul.msk.bf16.vlgmr.msra.gmra.mxu1 %vm380_vm9, %v1457_v33  ;;  %331 = vst [vmem:[#allocation2 + $0x8] sm:$0x1] %v330_v36  ;;  %680 = vmatpush.bf16.msrb.mxu0 %v1214_v60  ;;  %v1236_v10 = vld [vmem:[%s1573_s3 + $0x98] sm:$0xff]  ;;  %v1225_v11 = vld [vmem:[%s1573_s3 + $0x8] sm:$0xff]  ;;  %v1235_v12 = vld [vmem:[%s1573_s3 + $0x90] sm:$0xff] }
  0x23   : > { %640 = vmatpush.bf16.msra.mxu3 %v1220_v49  ;;  %762 = vmatpush.bf16.msrb.mxu1 %v1231_v51  ;;  %v1224_v15 = vld [vmem:[%s1573_s3] sm:$0xff]  ;;  %v1234_v17 = vld [vmem:[%s1573_s3 + $0x88] sm:$0xff]  ;;  %vm551_vm15 = vmand %vm550_vm14, %vm295_vm2 }
  0x24   : > { %858 = vmatpush.bf16.msrb.mxu2 %v1240_v57  ;;  %v1277_v18 = vld [vmem:[%s1572_s2] ss:$0 sm:$0xff]  ;;  %v552_v35 = vld [vmem:[#allocation3] sm:$0xf] }
  0x25   : > { %v1206_v37 = vld [vmem:[#allocation2] sm:$0xf0] }
  0x26   : > { %v1201_v38 = vld [vmem:[#allocation2] sm:$0xff]  ;;  %681 = vmatpush.bf16.msrb.mxu0 %v1213_v2 }
  0x27   : > { %v1020_v39 = vld [vmem:[#allocation2] sm:$0xe]  ;;  %996 = vmatmul.msk.bf16.vlgmr.msra.gmra.mxu0 %vm380_vm9, %v1201_v38  ;;  %641 = vmatpush.bf16.msra.mxu3 %v1219_v50 }
  0x28   : > { %v1021_v40 = vor.u32 %v1206_v37, %v1020_v39  ;;  %763 = vmatpush.bf16.msrb.mxu1 %v1230_v53  ;;  %859 = vmatpush.bf16.msrb.mxu2 %v1239_v61  ;;  %v1233_v21 = vld [vmem:[%s1573_s3 + $0x80] sm:$0xff] }
  0x29   : > { %v446_v41 = vld [vmem:[#allocation2 + $0x8] sm:$0x1] }
  0x2a   : > { %v461_v42 = vunpack.c.l.b16 %v446_v41  ;;  %v465_v44 = vrot.slane %v1021_v40, 1  ;;  %682 = vmatpush.bf16.msrb.mxu0 %v1212_v6 }
  0x2b   : > { %642 = vmatpush.bf16.msra.mxu3 %v1218_v52 }
  0x2c   : > { %v463_v43 = vpack.c.b16 %v461_v42, %v461_v42  ;;  %764 = vmatpush.bf16.msrb.mxu1 %v1229_v59  ;;  %860 = vmatpush.bf16.msrb.mxu2 %v1238_v3 }
  0x2e   : > { %v466_v45 = vrot.slane %v463_v43, 1  ;;  %683 = vmatpush.bf16.msrb.mxu0 %v1211_v9 }
  0x2f   : > { %643 = vmatpush.bf16.msra.mxu3 %v1217_v58 }
  0x30   : > { %v467_v46 = vsel %vm464_vm10, %v465_v44, %v466_v45  ;;  %765 = vmatpush.bf16.msrb.mxu1 %v1228_v1  ;;  %861 = vmatpush.bf16.msrb.mxu2 %v1237_v7 }
  0x31   : > { %1038 = vmatmul.msk.bf16.vlgmr.msra.gmra.mxu2 %vm380_vm9, %v467_v46  ;;  %v556_v46 = vld [vmem:[#allocation3 + $0x8] sm:$0x1] }
  0x33   : > { %644 = vmatpush.bf16.msra.mxu3 %v1216_v63 }
  0x34   : > { %766 = vmatpush.bf16.msrb.mxu1 %v1227_v5  ;;  %862 = vmatpush.bf16.msrb.mxu2 %v1236_v10 }
  0x37   : > { %645 = vmatpush.bf16.msra.mxu3 %v1215_v4  ;;  %1103 = vmatmul.msk.bf16.vlgmr.msrb.gmra.mxu0 %vm380_vm9, %v1457_v33 }
  0x38   : > { %767 = vmatpush.bf16.msrb.mxu1 %v1226_v8  ;;  %863 = vmatpush.bf16.msrb.mxu2 %v1235_v12  ;;  %v1278_v8 = vld [vmem:[%s1575_s5] ss:$0 sm:$0xff] }
  0x3c   : > { %768 = vmatpush.bf16.msrb.mxu1 %v1225_v11  ;;  %864 = vmatpush.bf16.msrb.mxu2 %v1234_v17 }
  0x40   : > { %769 = vmatpush.bf16.msrb.mxu1 %v1224_v15  ;;  %865 = vmatpush.bf16.msrb.mxu2 %v1233_v21 }
  0x9f   : > { %v439_v14 = vpop.f32.mrf.mxu1 }
  0xa4   : > { %v393_v13 = vpop.f32.mrf.mxu0 }
  0xa5   : > { %v440_v16 = vadd.f32 %v439_v14, %v393_v13 }
  0xa7   : > { %v441_v25 = vpop.f32.mrf.mxu1 }
  0xac   : > { %v395_v24 = vpop.f32.mrf.mxu0 }
  0xad   : > { %v442_v27 = vadd.f32 %v441_v25, %v395_v24 }
  0xb4   : > { %v504_v19 = vpop.f32.mrf.mxu2  ;;  %v685_v63 = vpop.f32.mrf.mxu0 }
  0xb5   : > { %v509_v20 = vadd.f32 %v504_v19, %v440_v16 }
  0xb7   : > { %v515_v22 = vadd.f32 %v1277_v18, %v509_v20 }
  0xb9   : > { %v517_v26 = vmax.f32 %v515_v22, 0.0 }
  0xbb   : > { %v519_v28 = vpack.c.bf16 %v517_v26, %v517_v26 }
  0xbc   : > { %v506_v29 = vpop.f32.mrf.mxu2  ;;  %v687_v3 = vpop.f32.mrf.mxu0 }
  0xbd   : > { %v531_v30 = vshrl.u32 %v519_v28, 16  ;;  %v510_v31 = vadd.f32 %v506_v29, %v442_v27  ;;  %v534_v33 = vshll.u32 %v519_v28, 16  ;;  %v586_v41 = vunpack.c.l.b16 %v519_v28 }
  0xbf   : > { %v533_v32 = vrot.slane %v531_v30, 7  ;;  %v516_v34 = vadd.f32 %v1277_v18, %v510_v31 }
  0xc1   : > { %v536_v36 = vor.u32 %v534_v33, %v533_v32  ;;  %v518_v37 = vmax.f32 %v516_v34, 0.0  ;;  %v537_v47 = vrot.slane %v533_v32, 4 }
  0xc3   : > { %v553_v38 = vsel %vm551_vm15, %v536_v36, %v552_v35  ;;  %v520_v39 = vpack.c.bf16 %v518_v37, %v518_v37 }
  0xc4   : > { %554 = vst [vmem:[#allocation3] sm:$0xf] %v553_v38 }
  0xc5   : > { %v539_v40 = vshrl.u32 %v520_v39, 16  ;;  %v587_v42 = vunpack.c.l.b16 %v520_v39  ;;  %v542_v44 = vshll.u32 %v520_v39, 16 }
  0xc7   : > { %v541_v43 = vrot.slane %v539_v40, 7  ;;  %v588_v45 = vpack.c.b16 %v587_v42, %v586_v41 }
  0xc9   : > { %v544_v48 = vor.u32 %v542_v44, %v541_v43  ;;  %v546_v49 = vrot.slane %v541_v43, 4  ;;  %646 = vmatmul.bf16.vlgmr.msra.gmra.mxu3 %v588_v45 }
  0xcb   : > { %v545_v50 = vsel %vm1449_vm6, %v537_v47, %v544_v48  ;;  %v557_v51 = vsel %vm1489_vm12, %v546_v49, %v556_v46  ;;  %v1158_v55 = vld [vmem:[#allocation3] sm:$0xe] }
  0xcc   : > { %555 = vst [vmem:[#allocation3 + $0x4] sm:$0xf] %v545_v50 }
  0xcd   : > { %558 = vst [vmem:[#allocation3 + $0x8] sm:$0x1] %v557_v51 }
  0xd3   : > { %v1223_v52 = vld [vmem:[#allocation3] sm:$0xff] }
  0xd4   : > { %v1232_v53 = vld [vmem:[#allocation3] sm:$0xf0]  ;;  %v780_v56 = vld [vmem:[#allocation3 + $0x8] sm:$0x1]  ;;  %770 = vmatmul.bf16.vlgmr.msrb.gmra.mxu1 %v1223_v52 }
  0xd5   : > { %v803_v57 = vunpack.c.l.b16 %v780_v56  ;;  %v1159_v58 = vor.u32 %v1232_v53, %v1158_v55 }
  0xd7   : > { %v805_v59 = vpack.c.b16 %v803_v57, %v803_v57  ;;  %v806_v60 = vrot.slane %v1159_v58, 1 }
  0xd9   : > { %v807_v61 = vrot.slane %v805_v59, 1 }
  0xdb   : > { %v808_v62 = vsel %vm464_vm10, %v806_v60, %v807_v61 }
  0xdc   : > { %866 = vmatmul.bf16.vlgmr.msrb.gmra.mxu2 %v808_v62 }
 0x14c   : > { %v647_v23 = vpop.f32.mrf.mxu3 }
 0x14d   : > { %v686_v1 = vadd.f32 %v685_v63, %v647_v23 }
 0x151   : > { %v771_v0 = vpop.f32.mrf.mxu1 }
 0x152   : > { %v776_v4 = vadd.f32 %v771_v0, %v686_v1 }
 0x154   : > { %v649_v2 = vpop.f32.mrf.mxu3 }
 0x155   : > { %v688_v6 = vadd.f32 %v687_v3, %v649_v2 }
 0x159   : > { %v773_v5 = vpop.f32.mrf.mxu1 }
 0x15a   : > { %v777_v9 = vadd.f32 %v773_v5, %v688_v6 }
 0x15f   : > { %v867_v54 = vpop.f32.mrf.mxu2 }
 0x160   : > { %v872_v7 = vadd.f32 %v867_v54, %v776_v4 }
 0x162   : > { %v878_v11 = vadd.f32 %v1278_v8, %v872_v7 }
 0x164   : > { %v880_v14 = vmax.f32 %v878_v11, 0.0 }
 0x167   : > { %v869_v10 = vpop.f32.mrf.mxu2 }
 0x168   : > { %v873_v12 = vadd.f32 %v869_v10, %v777_v9 }
 0x16a   : > { %v879_v13 = vadd.f32 %v1278_v8, %v873_v12 }
 0x16c   : > { %v881_v15 = vmax.f32 %v879_v13, 0.0 }
 0x16e   : > { %v1244_v16 = vpack.c.bf16 %v881_v15, %v880_v14 }
 0x170   : > { %1245 = vst [vmem:[%s285_s30] sm:$0xff] %v1244_v16  }
 0x171 PF: > { %s18_s21 = sadd.s32 1, %s1353_s21  }
 0x172   : > { %p15_p7 = scmp.ge.s32.totalorder %s18_s21, 4  }
 0x174   :  { %17 = sbr.rel (!%p15_p7) target bundleno = 2 (0x2), region = 87 }
 0x179   :  { %907 = vsyncpa [#allocation5], 1 }
 0x17a   :  { %909 = vsyncpa [#allocation5 + $0x1], 1 }
 0x17b   :  { %910 = vsyncpa [#allocation7], 1 }

</bundles_post_ra>
